<compile_context>
chip_gen: v5e
topology: v5e:2x2
jax: 0.10.0
libtpu: 0.0.40
codegen_flags: <defaults>
</compile_context>

<pallas_src>
import jax
import jax.numpy as jnp
from jax.experimental import pallas as pl
from jax.experimental.pallas import tpu as pltpu


TILE_B_MAX = 512  # max rows per grid step (review: 512 hits ~85% of HBM roofline)


def _round_up(x, m):
    return ((x + m - 1) // m) * m


def _pad2d(a, rows, cols):
    r, c = a.shape
    return jnp.pad(a, ((0, rows - r), (0, cols - c)))


def _choose_tile_b(b_rows):
    """Pick a batch tile: multiple of 8, <= TILE_B_MAX, and >= 2 grid tiles
    whenever the batch allows it (so both TensorCores on v7x get work)."""
    return min(TILE_B_MAX, _round_up(max(b_rows // 2, 8), 8))


def _ae_kernel(x_ref,
               w1_ref, b1_ref,
               w2_ref, b2_ref,
               w3_ref, b3_ref,
               w4_ref, b4_ref,
               out_ref, lat_ref):
    # x streamed as f32, cast to bf16 in VMEM (avoids a wrapper-side pad/cast
    # copy of the whole input in HBM).
    x = x_ref[...].astype(jnp.bfloat16)                                # (TB, 784)

    # encoder: Linear(784, H) -> ReLU -> (Dropout=id) -> Linear(H, L) -> ReLU
    h1 = jnp.dot(x, w1_ref[...], preferred_element_type=jnp.float32) + b1_ref[...]
    h1 = jnp.maximum(h1, 0.0).astype(jnp.bfloat16)                     # (TB, H_P)
    z = jnp.dot(h1, w2_ref[...], preferred_element_type=jnp.float32) + b2_ref[...]
    z = jnp.maximum(z, 0.0)                                            # (TB, L_P) f32
    # latent is emitted unpadded (true latent_dim columns), f32
    lat_ref[...] = z[:, : lat_ref.shape[1]].astype(lat_ref.dtype)

    # decoder: Linear(L, H) -> ReLU -> (Dropout=id) -> Linear(H, 784) -> Sigmoid
    h2 = jnp.dot(z.astype(jnp.bfloat16), w3_ref[...],
                 preferred_element_type=jnp.float32) + b3_ref[...]
    h2 = jnp.maximum(h2, 0.0).astype(jnp.bfloat16)                     # (TB, H_P)
    o = jnp.dot(h2, w4_ref[...], preferred_element_type=jnp.float32) + b4_ref[...]
    out_ref[...] = jax.nn.sigmoid(o).astype(out_ref.dtype)             # bf16 (TB, 784)


def ae_forward(x_nchw, params):
    """x_nchw: (B, C, 28, 28) with C*28*28 == 784.
    Returns (output (B, C, 28, 28) bf16, latent (B, latent_dim) f32)."""
    B = x_nchw.shape[0]
    x_flat = x_nchw.reshape(B, -1).astype(jnp.float32)                 # (B, 784)
    in_dim = x_flat.shape[1]
    assert in_dim == 784

    w1, b1, w2, b2, w3, b3, w4, b4 = params
    hidden_dim = w1.shape[1]
    latent_dim = w2.shape[1]

    # Lane-aligned hidden/latent widths (zero padding is exact through the net).
    H_P = _round_up(hidden_dim, 128)
    L_P = _round_up(latent_dim, 128)

    # Only batch needs rounding (to a sublane multiple); usually a no-op.
    B8 = _round_up(B, 8)
    if B8 != B:
        x_flat = jnp.pad(x_flat, ((0, B8 - B), (0, 0)))

    tile_b = _choose_tile_b(B8)
    grid = (pl.cdiv(B8, tile_b),)

    # Weights: bf16, padded on hidden/latent dims only. Biases stay f32.
    w1p = _pad2d(w1.astype(jnp.bfloat16), in_dim, H_P)
    b1p = _pad2d(b1, 1, H_P)
    w2p = _pad2d(w2.astype(jnp.bfloat16), H_P, L_P)
    b2p = _pad2d(b2, 1, L_P)
    w3p = _pad2d(w3.astype(jnp.bfloat16), L_P, H_P)
    b3p = _pad2d(b3, 1, H_P)
    w4p = _pad2d(w4.astype(jnp.bfloat16), H_P, in_dim)
    b4p = b4                                                            # (1, 784) f32

    def resident(arr):
        # Full-array block, constant block index -> stays VMEM-resident.
        return pl.BlockSpec(arr.shape, lambda i: (0, 0))

    # CostEstimate from the TRUE dims (not padded).
    flops = 2 * B * (in_dim * hidden_dim + hidden_dim * latent_dim
                     + latent_dim * hidden_dim + hidden_dim * in_dim)
    weight_bytes = sum(int(a.size) * a.dtype.itemsize
                       for a in (w1p, b1p, w2p, b2p, w3p, b3p, w4p, b4p))
    bytes_accessed = (B * in_dim * 4        # x read (f32)
                      + weight_bytes
                      + B * in_dim * 2      # reconstruction write (bf16)
                      + B * latent_dim * 4) # latent write (f32)
    cost = pl.CostEstimate(flops=int(flops),
                           transcendentals=int(B * in_dim),   # sigmoid
                           bytes_accessed=int(bytes_accessed))

    out_pad, lat_pad = pl.pallas_call(
        _ae_kernel,
        out_shape=(
            jax.ShapeDtypeStruct((B8, in_dim), jnp.bfloat16),
            jax.ShapeDtypeStruct((B8, latent_dim), jnp.float32),
        ),
        grid=grid,
        in_specs=[
            pl.BlockSpec((tile_b, in_dim), lambda i: (i, 0)),           # x tile (streamed)
            resident(w1p), resident(b1p),
            resident(w2p), resident(b2p),
            resident(w3p), resident(b3p),
            resident(w4p), resident(b4p),
        ],
        out_specs=(
            pl.BlockSpec((tile_b, in_dim), lambda i: (i, 0)),           # output tile
            pl.BlockSpec((tile_b, latent_dim), lambda i: (i, 0)),       # latent tile
        ),
        compiler_params=pltpu.CompilerParams(
            dimension_semantics=("parallel",),
            vmem_limit_bytes=32 * 1024 * 1024),
        cost_estimate=cost,
    )(x_flat, w1p, b1p, w2p, b2p, w3p, b3p, w4p, b4p)

    # Identity slice/reshape when B % 8 == 0 (no copy); tiny otherwise.
    output = out_pad[:B].reshape(B, -1, 28, 28)                         # (B, C, 28, 28) bf16
    latent = lat_pad[:B]                                                # (B, latent_dim) f32
    return output, latent


def init_params(key, hidden_dim, latent_dim):
    """Deterministic synthetic parameters matching nn.Linear shapes.
    Stored as (in, out) for x @ W; biases stored as (1, out) row vectors."""
    ks = jax.random.split(key, 8)

    def lin(kw, kb, fan_in, fan_out):
        bound = 1.0 / jnp.sqrt(fan_in)
        w = jax.random.uniform(kw, (fan_in, fan_out), jnp.float32, -bound, bound)
        b = jax.random.uniform(kb, (1, fan_out), jnp.float32, -bound, bound)
        return w, b

    w1, b1 = lin(ks[0], ks[1], 784, hidden_dim)
    w2, b2 = lin(ks[2], ks[3], hidden_dim, latent_dim)
    w3, b3 = lin(ks[4], ks[5], latent_dim, hidden_dim)
    w4, b4 = lin(ks[6], ks[7], hidden_dim, 784)
    return (w1, b1, w2, b2, w3, b3, w4, b4)


if __name__ == "__main__":
    hidden_dim = 32
    latent_dim = 16
    batch = 2

    key = jax.random.PRNGKey(0)
    k_x, k_p = jax.random.split(key)
    x = jax.random.uniform(k_x, (batch, 1, 28, 28), jnp.float32)        # NCHW input
    params = init_params(k_p, hidden_dim, latent_dim)

    output, latent = jax.jit(ae_forward)(x, params)
    jax.block_until_ready((output, latent))

    assert output.shape == (batch, 1, 28, 28)
    assert latent.shape == (batch, latent_dim)

    # Sanity check against a pure-JAX f32 reference (bf16 weights/activations
    # and bf16 reconstruction in the kernel => loosened tolerance).
    w1, b1, w2, b2, w3, b3, w4, b4 = params
    xf = x.reshape(batch, -1)
    h = jnp.maximum(xf @ w1 + b1, 0)
    z = jnp.maximum(h @ w2 + b2, 0)
    h2 = jnp.maximum(z @ w3 + b3, 0)
    o = jax.nn.sigmoid(h2 @ w4 + b4).reshape(batch, 1, 28, 28)
    assert jnp.allclose(output.astype(jnp.float32), o, atol=2e-2, rtol=2e-2), \
        "mismatch vs reference"
    assert jnp.allclose(latent, z, atol=2e-2, rtol=2e-2), "latent mismatch vs reference"

    print("KERNEL_OK")
</pallas_src>

<mosaic_0001>
module attributes {stable_mosaic.version = 11 : i64} {
  func.func @_ae_kernel(%arg0: i32, %arg1: memref<8x784xf32, #tpu.memory_space<vmem>>, %arg2: memref<784x128xbf16, #tpu.memory_space<vmem>>, %arg3: memref<1x128xf32, #tpu.memory_space<vmem>>, %arg4: memref<128x128xbf16, #tpu.memory_space<vmem>>, %arg5: memref<1x128xf32, #tpu.memory_space<vmem>>, %arg6: memref<128x128xbf16, #tpu.memory_space<vmem>>, %arg7: memref<1x128xf32, #tpu.memory_space<vmem>>, %arg8: memref<128x784xbf16, #tpu.memory_space<vmem>>, %arg9: memref<1x784xf32, #tpu.memory_space<vmem>>, %arg10: memref<8x784xbf16, #tpu.memory_space<vmem>>, %arg11: memref<8x16xf32, #tpu.memory_space<vmem>>) attributes {dimension_semantics = [#tpu.dimension_semantics<parallel>], iteration_bounds = array<i64: 1>, scalar_prefetch = 0 : i64, scratch_operands = 0 : i64, tpu.core_type = #tpu.core_type<tc>, window_params = [{transform_indices = @transform_0, window_bounds = array<i64: 8, 784>}, {pipeline_mode = #tpu.pipeline_mode<synchronous>, transform_indices = @transform_1, window_bounds = array<i64: 784, 128>}, {pipeline_mode = #tpu.pipeline_mode<synchronous>, transform_indices = @transform_2, window_bounds = array<i64: 1, 128>}, {pipeline_mode = #tpu.pipeline_mode<synchronous>, transform_indices = @transform_3, window_bounds = array<i64: 128, 128>}, {pipeline_mode = #tpu.pipeline_mode<synchronous>, transform_indices = @transform_4, window_bounds = array<i64: 1, 128>}, {pipeline_mode = #tpu.pipeline_mode<synchronous>, transform_indices = @transform_5, window_bounds = array<i64: 128, 128>}, {pipeline_mode = #tpu.pipeline_mode<synchronous>, transform_indices = @transform_6, window_bounds = array<i64: 1, 128>}, {pipeline_mode = #tpu.pipeline_mode<synchronous>, transform_indices = @transform_7, window_bounds = array<i64: 128, 784>}, {pipeline_mode = #tpu.pipeline_mode<synchronous>, transform_indices = @transform_8, window_bounds = array<i64: 1, 784>}, {transform_indices = @transform_9, window_bounds = array<i64: 8, 784>}, {transform_indices = @transform_10, window_bounds = array<i64: 8, 16>}]} {
    %c0 = arith.constant 0 : index
    %c0_0 = arith.constant 0 : index
    %0 = vector.load %arg1[%c0, %c0_0] : memref<8x784xf32, #tpu.memory_space<vmem>>, vector<8x784xf32>
    %1 = arith.truncf %0 : vector<8x784xf32> to vector<8x784xbf16>
    %c0_1 = arith.constant 0 : index
    %c0_2 = arith.constant 0 : index
    %2 = vector.load %arg2[%c0_1, %c0_2] : memref<784x128xbf16, #tpu.memory_space<vmem>>, vector<784x128xbf16>
    %cst = arith.constant dense<0.000000e+00> : vector<8x128xf32>
    %3 = tpu.matmul %1, %2, %cst {dimension_numbers = #tpu.dot_dimension_numbers<[1], [0], [0], [1], [0, 0, 1, 1], [], []>} : vector<8x784xbf16>, vector<784x128xbf16>, vector<8x128xf32> -> vector<8x128xf32>
    %c0_3 = arith.constant 0 : index
    %c0_4 = arith.constant 0 : index
    %4 = vector.load %arg3[%c0_3, %c0_4] : memref<1x128xf32, #tpu.memory_space<vmem>>, vector<1x128xf32>
    %5 = vector.broadcast %4 : vector<1x128xf32> to vector<8x128xf32>
    %6 = arith.addf %3, %5 : vector<8x128xf32>
    %cst_5 = arith.constant 0.000000e+00 : f32
    %7 = vector.broadcast %cst_5 : f32 to vector<8x128xf32>
    %8 = arith.maximumf %6, %7 : vector<8x128xf32>
    %9 = arith.truncf %8 : vector<8x128xf32> to vector<8x128xbf16>
    %c0_6 = arith.constant 0 : index
    %c0_7 = arith.constant 0 : index
    %10 = vector.load %arg4[%c0_6, %c0_7] : memref<128x128xbf16, #tpu.memory_space<vmem>>, vector<128x128xbf16>
    %cst_8 = arith.constant dense<0.000000e+00> : vector<8x128xf32>
    %11 = tpu.matmul %9, %10, %cst_8 {dimension_numbers = #tpu.dot_dimension_numbers<[1], [0], [0], [1], [0, 0, 1, 1], [], []>} : vector<8x128xbf16>, vector<128x128xbf16>, vector<8x128xf32> -> vector<8x128xf32>
    %c0_9 = arith.constant 0 : index
    %c0_10 = arith.constant 0 : index
    %12 = vector.load %arg5[%c0_9, %c0_10] : memref<1x128xf32, #tpu.memory_space<vmem>>, vector<1x128xf32>
    %13 = vector.broadcast %12 : vector<1x128xf32> to vector<8x128xf32>
    %14 = arith.addf %11, %13 : vector<8x128xf32>
    %cst_11 = arith.constant 0.000000e+00 : f32
    %15 = vector.broadcast %cst_11 : f32 to vector<8x128xf32>
    %16 = arith.maximumf %14, %15 : vector<8x128xf32>
    %17 = vector.extract_strided_slice %16 {offsets = [0, 0], sizes = [8, 16], strides = [1, 1]} : vector<8x128xf32> to vector<8x16xf32>
    %c0_12 = arith.constant 0 : index
    %c0_13 = arith.constant 0 : index
    %18 = vector.load %arg11[%c0_12, %c0_13] : memref<8x16xf32, #tpu.memory_space<vmem>>, vector<8x16xf32>
    tpu.vector_store %arg11[%c0_12, %c0_13], %17 {strides = array<i32>} : memref<8x16xf32, #tpu.memory_space<vmem>>, vector<8x16xf32>,
    %19 = arith.truncf %16 : vector<8x128xf32> to vector<8x128xbf16>
    %c0_14 = arith.constant 0 : index
    %c0_15 = arith.constant 0 : index
    %20 = vector.load %arg6[%c0_14, %c0_15] : memref<128x128xbf16, #tpu.memory_space<vmem>>, vector<128x128xbf16>
    %cst_16 = arith.constant dense<0.000000e+00> : vector<8x128xf32>
    %21 = tpu.matmul %19, %20, %cst_16 {dimension_numbers = #tpu.dot_dimension_numbers<[1], [0], [0], [1], [0, 0, 1, 1], [], []>} : vector<8x128xbf16>, vector<128x128xbf16>, vector<8x128xf32> -> vector<8x128xf32>
    %c0_17 = arith.constant 0 : index
    %c0_18 = arith.constant 0 : index
    %22 = vector.load %arg7[%c0_17, %c0_18] : memref<1x128xf32, #tpu.memory_space<vmem>>, vector<1x128xf32>
    %23 = vector.broadcast %22 : vector<1x128xf32> to vector<8x128xf32>
    %24 = arith.addf %21, %23 : vector<8x128xf32>
    %cst_19 = arith.constant 0.000000e+00 : f32
    %25 = vector.broadcast %cst_19 : f32 to vector<8x128xf32>
    %26 = arith.maximumf %24, %25 : vector<8x128xf32>
    %27 = arith.truncf %26 : vector<8x128xf32> to vector<8x128xbf16>
    %c0_20 = arith.constant 0 : index
    %c0_21 = arith.constant 0 : index
    %28 = vector.load %arg8[%c0_20, %c0_21] : memref<128x784xbf16, #tpu.memory_space<vmem>>, vector<128x784xbf16>
    %cst_22 = arith.constant dense<0.000000e+00> : vector<8x784xf32>
    %29 = tpu.matmul %27, %28, %cst_22 {dimension_numbers = #tpu.dot_dimension_numbers<[1], [0], [0], [1], [0, 0, 1, 1], [], []>} : vector<8x128xbf16>, vector<128x784xbf16>, vector<8x784xf32> -> vector<8x784xf32>
    %c0_23 = arith.constant 0 : index
    %c0_24 = arith.constant 0 : index
    %30 = vector.load %arg9[%c0_23, %c0_24] : memref<1x784xf32, #tpu.memory_space<vmem>>, vector<1x784xf32>
    %31 = vector.broadcast %30 : vector<1x784xf32> to vector<8x784xf32>
    %32 = arith.addf %29, %31 : vector<8x784xf32>
    %33 = arith.negf %32 : vector<8x784xf32>
    %34 = math.exp %33 : vector<8x784xf32>
    %cst_25 = arith.constant 1.000000e+00 : f32
    %35 = vector.broadcast %cst_25 : f32 to vector<8x784xf32>
    %36 = arith.addf %35, %34 : vector<8x784xf32>
    %37 = arith.divf %35, %36 : vector<8x784xf32>
    %38 = arith.truncf %37 : vector<8x784xf32> to vector<8x784xbf16>
    %c0_26 = arith.constant 0 : index
    %c0_27 = arith.constant 0 : index
    %39 = vector.load %arg10[%c0_26, %c0_27] : memref<8x784xbf16, #tpu.memory_space<vmem>>, vector<8x784xbf16>
    tpu.vector_store %arg10[%c0_26, %c0_27], %38 {strides = array<i32>} : memref<8x784xbf16, #tpu.memory_space<vmem>>, vector<8x784xbf16>,
    return
  }
  func.func @transform_0(%arg0: i32) -> (i32, i32) {
    %c0_i32 = arith.constant 0 : i32
    %c0_i32_0 = arith.constant 0 : i32
    return %arg0, %c0_i32 : i32, i32
  }
  func.func @transform_1(%arg0: i32) -> (i32, i32) {
    %c0_i32 = arith.constant 0 : i32
    %c0_i32_0 = arith.constant 0 : i32
    %c0_i32_1 = arith.constant 0 : i32
    return %c0_i32, %c0_i32_0 : i32, i32
  }
  func.func @transform_2(%arg0: i32) -> (i32, i32) {
    %c0_i32 = arith.constant 0 : i32
    %c0_i32_0 = arith.constant 0 : i32
    %c0_i32_1 = arith.constant 0 : i32
    return %c0_i32, %c0_i32_0 : i32, i32
  }
  func.func @transform_3(%arg0: i32) -> (i32, i32) {
    %c0_i32 = arith.constant 0 : i32
    %c0_i32_0 = arith.constant 0 : i32
    %c0_i32_1 = arith.constant 0 : i32
    return %c0_i32, %c0_i32_0 : i32, i32
  }
  func.func @transform_4(%arg0: i32) -> (i32, i32) {
    %c0_i32 = arith.constant 0 : i32
    %c0_i32_0 = arith.constant 0 : i32
    %c0_i32_1 = arith.constant 0 : i32
    return %c0_i32, %c0_i32_0 : i32, i32
  }
  func.func @transform_5(%arg0: i32) -> (i32, i32) {
    %c0_i32 = arith.constant 0 : i32
    %c0_i32_0 = arith.constant 0 : i32
    %c0_i32_1 = arith.constant 0 : i32
    return %c0_i32, %c0_i32_0 : i32, i32
  }
  func.func @transform_6(%arg0: i32) -> (i32, i32) {
    %c0_i32 = arith.constant 0 : i32
    %c0_i32_0 = arith.constant 0 : i32
    %c0_i32_1 = arith.constant 0 : i32
    return %c0_i32, %c0_i32_0 : i32, i32
  }
  func.func @transform_7(%arg0: i32) -> (i32, i32) {
    %c0_i32 = arith.constant 0 : i32
    %c0_i32_0 = arith.constant 0 : i32
    %c0_i32_1 = arith.constant 0 : i32
    return %c0_i32, %c0_i32_0 : i32, i32
  }
  func.func @transform_8(%arg0: i32) -> (i32, i32) {
    %c0_i32 = arith.constant 0 : i32
    %c0_i32_0 = arith.constant 0 : i32
    %c0_i32_1 = arith.constant 0 : i32
    return %c0_i32, %c0_i32_0 : i32, i32
  }
  func.func @transform_9(%arg0: i32) -> (i32, i32) {
    %c0_i32 = arith.constant 0 : i32
    %c0_i32_0 = arith.constant 0 : i32
    return %arg0, %c0_i32 : i32, i32
  }
  func.func @transform_10(%arg0: i32) -> (i32, i32) {
    %c0_i32 = arith.constant 0 : i32
    %c0_i32_0 = arith.constant 0 : i32
    return %arg0, %c0_i32 : i32, i32
  }
}

</mosaic_0001>

<bundles_post_ra>
// kernel: ae_forward.1
= control target key start
LH: loop header
LB: loop body
LE: loop exit
PB: predicated region body
PF: predicated region fallthrough
CT: control target
= control target key end

     0   :  { %vm445_vm0 = vcmask 130048   ;;  %s2622_s1 = inlined_call_operand.vmem [shape: bf16[784,128], index: 1, kind: input, shape index: {}]   ;;  %s2623_s2 = inlined_call_operand.vmem [shape: f32[1,128], index: 2, kind: input, shape index: {}]   ;;  %s2624_s0 = inlined_call_operand.vmem [shape: f32[8,784], index: 0, kind: input, shape index: {}]   ;;  %s2625_s4 = inlined_call_operand.vmem [shape: f32[1,128], index: 4, kind: input, shape index: {}]   ;;  %s2626_s3 = inlined_call_operand.vmem [shape: bf16[128,128], index: 3, kind: input, shape index: {}]   ;;  %s2627_s5 = inlined_call_operand.vmem [shape: bf16[128,128], index: 5, kind: input, shape index: {}]   ;;  %s2628_s6 = inlined_call_operand.vmem [shape: f32[1,128], index: 6, kind: input, shape index: {}]   ;;  %s2629_s7 = inlined_call_operand.vmem [shape: bf16[128,784], index: 7, kind: input, shape index: {}]   ;;  %s2630_s10 = inlined_call_operand.vmem [shape: f32[8,16], index: 10, kind: output, shape index: {1}]   ;;  %s2631_s8 = inlined_call_operand.vmem [shape: f32[1,784], index: 8, kind: input, shape index: {}]   ;;  %s2632_s9 = inlined_call_operand.vmem [shape: bf16[8,784], index: 9, kind: output, shape index: {0}]  }
   0x1   :  { %v1817_v0 = vld [vmem:[%s2622_s1 + $0x38] sm:$0xff]  ;;  %v1816_v3 = vld [vmem:[%s2622_s1 + $0x30] sm:$0xff]  ;;  %v1815_v8 = vld [vmem:[%s2622_s1 + $0x28] sm:$0xff] }
   0x2   :  { %v1825_v1 = vld [vmem:[%s2622_s1 + $0x78] sm:$0xff]  ;;  %449 = vmatpush.bf16.msra.mxu0 %v1817_v0  ;;  %v1824_v4 = vld [vmem:[%s2622_s1 + $0x70] sm:$0xff]  ;;  %v1823_v9 = vld [vmem:[%s2622_s1 + $0x68] sm:$0xff] }
   0x3   :  { %v1833_v2 = vld [vmem:[%s2622_s1 + $0xb8] sm:$0xff]  ;;  %462 = vmatpush.bf16.msra.mxu1 %v1825_v1  ;;  %v1832_v5 = vld [vmem:[%s2622_s1 + $0xb0] sm:$0xff]  ;;  %v1831_v10 = vld [vmem:[%s2622_s1 + $0xa8] sm:$0xff] }
   0x4   :  { %475 = vmatpush.bf16.msra.mxu2 %v1833_v2  ;;  %v1841_v6 = vld [vmem:[%s2622_s1 + $0xf8] sm:$0xff]  ;;  %v1840_v7 = vld [vmem:[%s2622_s1 + $0xf0] sm:$0xff]  ;;  %v1839_v11 = vld [vmem:[%s2622_s1 + $0xe8] sm:$0xff] }
   0x5   :  { %488 = vmatpush.bf16.msra.mxu3 %v1841_v6  ;;  %v1814_v12 = vld [vmem:[%s2622_s1 + $0x20] sm:$0xff]  ;;  %v1813_v16 = vld [vmem:[%s2622_s1 + $0x18] sm:$0xff]  ;;  %v1812_v20 = vld [vmem:[%s2622_s1 + $0x10] sm:$0xff] }
   0x6   :  { %450 = vmatpush.bf16.msra.mxu0 %v1816_v3  ;;  %v1822_v13 = vld [vmem:[%s2622_s1 + $0x60] sm:$0xff]  ;;  %v1821_v17 = vld [vmem:[%s2622_s1 + $0x58] sm:$0xff]  ;;  %v1820_v21 = vld [vmem:[%s2622_s1 + $0x50] sm:$0xff] }
   0x7   :  { %463 = vmatpush.bf16.msra.mxu1 %v1824_v4  ;;  %v1830_v14 = vld [vmem:[%s2622_s1 + $0xa0] sm:$0xff]  ;;  %v1829_v18 = vld [vmem:[%s2622_s1 + $0x98] sm:$0xff]  ;;  %v1828_v22 = vld [vmem:[%s2622_s1 + $0x90] sm:$0xff] }
   0x8   :  { %476 = vmatpush.bf16.msra.mxu2 %v1832_v5  ;;  %v1838_v15 = vld [vmem:[%s2622_s1 + $0xe0] sm:$0xff]  ;;  %v1837_v19 = vld [vmem:[%s2622_s1 + $0xd8] sm:$0xff]  ;;  %v1836_v23 = vld [vmem:[%s2622_s1 + $0xd0] sm:$0xff] }
   0x9   :  { %489 = vmatpush.bf16.msra.mxu3 %v1840_v7  ;;  %v1811_v24 = vld [vmem:[%s2622_s1 + $0x8] sm:$0xff]  ;;  %v1810_v27 = vld [vmem:[%s2622_s1] sm:$0xff]  ;;  %v1849_v32 = vld [vmem:[%s2622_s1 + $0x138] sm:$0xff] }
   0xa   :  { %451 = vmatpush.bf16.msra.mxu0 %v1815_v8  ;;  %v1819_v25 = vld [vmem:[%s2622_s1 + $0x48] sm:$0xff]  ;;  %v1818_v29 = vld [vmem:[%s2622_s1 + $0x40] sm:$0xff]  ;;  %v1857_v33 = vld [vmem:[%s2622_s1 + $0x178] sm:$0xff] }
   0xb   :  { %464 = vmatpush.bf16.msra.mxu1 %v1823_v9  ;;  %v1827_v26 = vld [vmem:[%s2622_s1 + $0x88] sm:$0xff]  ;;  %v35_v30 = vld [vmem:[%s2624_s0] sm:$0xff]  ;;  %v37_v35 = vld [vmem:[%s2624_s0 + $0x10] sm:$0xff] }
   0xc   :  { %477 = vmatpush.bf16.msra.mxu2 %v1831_v10  ;;  %v1835_v28 = vld [vmem:[%s2622_s1 + $0xc8] sm:$0xff]  ;;  %v1826_v34 = vld [vmem:[%s2622_s1 + $0x80] sm:$0xff]  ;;  %v42_v36 = vpack.c.bf16 %v35_v30, %v35_v30  ;;  %v38_v40 = vld [vmem:[%s2624_s0 + $0x18] sm:$0xff]  ;;  %v44_v43 = vpack.c.bf16 %v37_v35, %v37_v35 }
   0xd   :  { %490 = vmatpush.bf16.msra.mxu3 %v1839_v11  ;;  %v36_v31 = vld [vmem:[%s2624_s0 + $0x8] sm:$0xff]  ;;  %v1834_v38 = vld [vmem:[%s2622_s1 + $0xc0] sm:$0xff]  ;;  %v1848_v41 = vld [vmem:[%s2622_s1 + $0x130] sm:$0xff]  ;;  %v45_v44 = vpack.c.bf16 %v38_v40, %v38_v40 }
   0xe   :  { %452 = vmatpush.bf16.msra.mxu0 %v1814_v12  ;;  %v43_v37 = vpack.c.bf16 %v36_v31, %v36_v31  ;;  %v1858_v39 = vld [vmem:[%s2622_s1 + $0x180] sm:$0xff]  ;;  %v1856_v42 = vld [vmem:[%s2622_s1 + $0x170] sm:$0xff]  ;;  %v1847_v45 = vld [vmem:[%s2622_s1 + $0x128] sm:$0xff] }
   0xf   :  { %465 = vmatpush.bf16.msra.mxu1 %v1822_v13  ;;  %v1855_v46 = vld [vmem:[%s2622_s1 + $0x168] sm:$0xff]  ;;  %v1846_v47 = vld [vmem:[%s2622_s1 + $0x120] sm:$0xff]  ;;  %v1845_v49 = vld [vmem:[%s2622_s1 + $0x118] sm:$0xff] }
  0x10   :  { %478 = vmatpush.bf16.msra.mxu2 %v1830_v14  ;;  %v1854_v48 = vld [vmem:[%s2622_s1 + $0x160] sm:$0xff]  ;;  %v1853_v50 = vld [vmem:[%s2622_s1 + $0x158] sm:$0xff]  ;;  %v41_v51 = vld [vmem:[%s2624_s0 + $0x30] sm:$0xff] }
  0x11   :  { %491 = vmatpush.bf16.msra.mxu3 %v1838_v15  ;;  %v1844_v52 = vld [vmem:[%s2622_s1 + $0x110] sm:$0xff]  ;;  %v48_v54 = vpack.c.bf16 %v41_v51, %v41_v51  ;;  %v1843_v55 = vld [vmem:[%s2622_s1 + $0x108] sm:$0xff]  ;;  %v1842_v57 = vld [vmem:[%s2622_s1 + $0x100] sm:$0xff] }
  0x12   :  { %453 = vmatpush.bf16.msra.mxu0 %v1813_v16  ;;  %v1852_v53 = vld [vmem:[%s2622_s1 + $0x150] sm:$0xff]  ;;  %v1851_v56 = vld [vmem:[%s2622_s1 + $0x148] sm:$0xff]  ;;  %v1850_v58 = vld [vmem:[%s2622_s1 + $0x140] sm:$0xff] }
  0x13   :  { %466 = vmatpush.bf16.msra.mxu1 %v1821_v17  ;;  %v39_v59 = vld [vmem:[%s2624_s0 + $0x20] sm:$0xff]  ;;  %v40_v60 = vld [vmem:[%s2624_s0 + $0x28] sm:$0xff]  ;;  %v1866_v63 = vld [vmem:[%s2626_s3 + $0x38] sm:$0xff] }
  0x14   :  { %479 = vmatpush.bf16.msra.mxu2 %v1829_v18  ;;  %v46_v61 = vpack.c.bf16 %v39_v59, %v39_v59  ;;  %v47_v62 = vpack.c.bf16 %v40_v60, %v40_v60  ;;  %v1865_v0 = vld [vmem:[%s2626_s3 + $0x30] sm:$0xff]  ;;  %v1864_v1 = vld [vmem:[%s2626_s3 + $0x28] sm:$0xff]  ;;  %v1863_v2 = vld [vmem:[%s2626_s3 + $0x20] sm:$0xff] }
  0x15   :  { %492 = vmatpush.bf16.msra.mxu3 %v1837_v19  ;;  %v1862_v3 = vld [vmem:[%s2626_s3 + $0x18] sm:$0xff]  ;;  %v1861_v4 = vld [vmem:[%s2626_s3 + $0x10] sm:$0xff]  ;;  %v1860_v5 = vld [vmem:[%s2626_s3 + $0x8] sm:$0xff] }
  0x16   :  { %454 = vmatpush.bf16.msra.mxu0 %v1812_v20  ;;  %v1859_v8 = vld [vmem:[%s2626_s3] sm:$0xff]  ;;  %v1874_v11 = vld [vmem:[%s2627_s5 + $0x38] sm:$0xff]  ;;  %v1873_v14 = vld [vmem:[%s2627_s5 + $0x30] sm:$0xff] }
  0x17   :  { %467 = vmatpush.bf16.msra.mxu1 %v1820_v21  ;;  %v1931_v15 = vld [vmem:[%s2623_s2] ss:$0 sm:$0xff]  ;;  %v1872_v16 = vld [vmem:[%s2627_s5 + $0x28] sm:$0xff]  ;;  %v1927_v40 = vld [vmem:[%s2629_s7 + $0x1a0] sm:$0xf0] }
  0x18   :  { %480 = vmatpush.bf16.msra.mxu2 %v1828_v22  ;;  %v1871_v20 = vld [vmem:[%s2627_s5 + $0x20] sm:$0xff]  ;;  %v1870_v22 = vld [vmem:[%s2627_s5 + $0x18] sm:$0xff] }
  0x19   :  { %493 = vmatpush.bf16.msra.mxu3 %v1836_v23  ;;  %v1910_v59 = vld [vmem:[%s2629_s7 + $0x11c] sm:$0xf]  ;;  %v1723_v60 = vld [vmem:[%s2629_s7 + $0x134] sm:$0xf0] }
  0x1a   :  { %455 = vmatpush.bf16.msra.mxu0 %v1811_v24 }
  0x1b   :  { %468 = vmatpush.bf16.msra.mxu1 %v1819_v25  ;;  %v1869_v25 = vld [vmem:[%s2627_s5 + $0x10] sm:$0xff] }
  0x1c   :  { %481 = vmatpush.bf16.msra.mxu2 %v1827_v26 }
  0x1d   :  { %494 = vmatpush.bf16.msra.mxu3 %v1835_v28 }
  0x1e   :  { %456 = vmatpush.bf16.msra.mxu0 %v1810_v27 }
  0x1f   :  { %469 = vmatpush.bf16.msra.mxu1 %v1818_v29 }
  0x20   :  { %482 = vmatpush.bf16.msra.mxu2 %v1826_v34 }
  0x21   :  { %457 = vmatmul.bf16.vlgmr.msra.gmra.mxu0 %v42_v36  ;;  %495 = vmatpush.bf16.msra.mxu3 %v1834_v38  ;;  %v1867_v38 = vld [vmem:[%s2627_s5] sm:$0xff] }
  0x22   :  { %501 = vmatpush.bf16.msrb.mxu0 %v1849_v32  ;;  %470 = vmatmul.bf16.vlgmr.msra.gmra.mxu1 %v43_v37  ;;  %v1868_v37 = vld [vmem:[%s2627_s5 + $0x8] sm:$0xff] }
  0x23   :  { %514 = vmatpush.bf16.msrb.mxu1 %v1857_v33  ;;  %483 = vmatmul.bf16.vlgmr.msra.gmra.mxu2 %v44_v43  ;;  %v1779_v43 = vld [vmem:[%s2629_s7 + $0x1a4] sm:$0xf0] }
  0x24   :  { %534 = vmatpush.bf16.msrb.mxu2 %v1858_v39  ;;  %496 = vmatmul.bf16.vlgmr.msra.gmra.mxu3 %v45_v44  ;;  %v1777_v39 = vld [vmem:[%s2629_s7 + $0x188] sm:$0xf]  ;;  %v1785_v44 = vld [vmem:[%s2629_s7 + $0x190] sm:$0xf] }
  0x25   :  { %610 = vmatpush.bf16.msrb.mxu3 %v1866_v63 }
  0x26   :  { %502 = vmatpush.bf16.msrb.mxu0 %v1848_v41  ;;  %v1924_v41 = vld [vmem:[%s2629_s7 + $0x18c] sm:$0xf] }
  0x27   :  { %515 = vmatpush.bf16.msrb.mxu1 %v1856_v42  ;;  %v1778_v42 = vor.u32 %v1927_v40, %v1777_v39  ;;  %v1609_v39 = vld [vmem:[%s2629_s7 + $0x38] sm:$0xf]  ;;  %v1885_v40 = vld [vmem:[%s2629_s7 + $0x50] sm:$0xf0] }
  0x28   :  { %694 = vmatpush.bf16.msra.mxu2 %v1874_v11  ;;  %v1918_v11 = vld [vmem:[%s2629_s7 + $0x15c] sm:$0xf] }
  0x29   :  { %611 = vmatpush.bf16.msrb.mxu3 %v1865_v0  ;;  %v1693_v0 = vld [vmem:[%s2629_s7 + $0xe0] sm:$0xf] }
  0x2a   :  { %503 = vmatpush.bf16.msrb.mxu0 %v1847_v45  ;;  %v1928_v45 = vld [vmem:[%s2629_s7 + $0x1a8] sm:$0xf0] }
  0x2b   :  { %516 = vmatpush.bf16.msrb.mxu1 %v1855_v46  ;;  %v1782_v46 = vor.u32 %v1924_v41, %v1779_v43 }
  0x2c   :  { %695 = vmatpush.bf16.msra.mxu2 %v1873_v14  ;;  %v1899_v14 = vld [vmem:[%s2629_s7 + $0xc0] sm:$0xf0] }
  0x2d   :  { %612 = vmatpush.bf16.msrb.mxu3 %v1864_v1  ;;  %v1906_v1 = vld [vmem:[%s2629_s7 + $0xf8] sm:$0xf0] }
  0x2e   :  { %504 = vmatpush.bf16.msrb.mxu0 %v1846_v47  ;;  %v1786_v47 = vor.u32 %v1928_v45, %v1785_v44  ;;  %v1882_v44 = vld [vmem:[%s2629_s7 + $0x3c] sm:$0xf]  ;;  %v1897_v45 = vld [vmem:[%s2629_s7 + $0xb4] sm:$0xf] }
  0x2f   :  { %517 = vmatpush.bf16.msrb.mxu1 %v1854_v48  ;;  %v1749_v48 = vld [vmem:[%s2629_s7 + $0x150] sm:$0xf] }
  0x30   :  { %696 = vmatpush.bf16.msra.mxu2 %v1872_v16 }
  0x31   :  { %613 = vmatpush.bf16.msrb.mxu3 %v1863_v2  ;;  %v1726_v2 = vor.u32 %v1910_v59, %v1723_v60  ;;  %v1589_v59 = vld [vmem:[%s2629_s7 + $0x8] sm:$0xf]  ;;  %v1879_v60 = vld [vmem:[%s2629_s7 + $0x20] sm:$0xf0] }
  0x32   :  { %505 = vmatpush.bf16.msrb.mxu0 %v1845_v49  ;;  %v1920_v49 = vld [vmem:[%s2629_s7 + $0x168] sm:$0xf0] }
  0x33   :  { %518 = vmatpush.bf16.msrb.mxu1 %v1853_v50  ;;  %1514 = vmatmul.msk.bf16.vlgmr.msrb.gmra.mxu2 %vm445_vm0, %v48_v54  ;;  %v1917_v50 = vld [vmem:[%s2629_s7 + $0x154] sm:$0xf]  ;;  %v1750_v51 = vor.u32 %v1920_v49, %v1749_v48  ;;  %v1617_v48 = vld [vmem:[%s2629_s7 + $0x40] sm:$0xf]  ;;  %v1886_v49 = vld [vmem:[%s2629_s7 + $0x58] sm:$0xf0] }
  0x34   :  { %697 = vmatpush.bf16.msra.mxu2 %v1871_v20  ;;  %v1921_v54 = vld [vmem:[%s2629_s7 + $0x170] sm:$0xf0]  ;;  %v1673_v20 = vld [vmem:[%s2629_s7 + $0xb0] sm:$0xf] }
  0x35   :  { %614 = vmatpush.bf16.msrb.mxu3 %v1862_v3 }
  0x36   :  { %506 = vmatpush.bf16.msrb.mxu0 %v1844_v52  ;;  %v1751_v52 = vld [vmem:[%s2629_s7 + $0x16c] sm:$0xf0] }
  0x37   :  { %519 = vmatpush.bf16.msrb.mxu1 %v1852_v53  ;;  %v1757_v53 = vld [vmem:[%s2629_s7 + $0x158] sm:$0xf] }
  0x38   :  { %698 = vmatpush.bf16.msra.mxu2 %v1870_v22  ;;  %v1900_v22 = vld [vmem:[%s2629_s7 + $0xc8] sm:$0xf0] }
  0x39   :  { %615 = vmatpush.bf16.msrb.mxu3 %v1861_v4  ;;  %v1903_v4 = vld [vmem:[%s2629_s7 + $0xe4] sm:$0xf] }
  0x3a   :  { %507 = vmatpush.bf16.msrb.mxu0 %v1843_v55  ;;  %v1754_v55 = vor.u32 %v1917_v50, %v1751_v52  ;;  %v1610_v50 = vor.u32 %v1885_v40, %v1609_v39  ;;  %v1878_v52 = vld [vmem:[%s2629_s7 + $0x18] sm:$0xf0]  ;;  %v1709_v39 = vld [vmem:[%s2629_s7 + $0xf0] sm:$0xf] }
  0x3b   :  { %520 = vmatpush.bf16.msrb.mxu1 %v1851_v56  ;;  %v1758_v56 = vor.u32 %v1921_v54, %v1757_v53  ;;  %v1875_v53 = vld [vmem:[%s2629_s7 + $0x4] sm:$0xf] }
  0x3c   :  { %699 = vmatpush.bf16.msra.mxu2 %v1869_v25 }
  0x3d   :  { %616 = vmatpush.bf16.msrb.mxu3 %v1860_v5  ;;  %v1925_v5 = vld [vmem:[%s2629_s7 + $0x194] sm:$0xf] }
  0x3e   :  { %508 = vmatpush.bf16.msrb.mxu0 %v1842_v57  ;;  %v1721_v57 = vld [vmem:[%s2629_s7 + $0x118] sm:$0xf] }
  0x3f   :  { %521 = vmatpush.bf16.msrb.mxu1 %v1850_v58  ;;  %v1913_v58 = vld [vmem:[%s2629_s7 + $0x130] sm:$0xf0] }
  0x40   :  { %700 = vmatpush.bf16.msra.mxu2 %v1868_v37  ;;  %v1722_v63 = vor.u32 %v1913_v58, %v1721_v57  ;;  %v1932_v37 = vld [vmem:[%s2625_s4] ss:$0 sm:$0xff]  ;;  %v1618_v57 = vor.u32 %v1886_v49, %v1617_v48  ;;  %v1681_v49 = vld [vmem:[%s2629_s7 + $0xb8] sm:$0xf] }
  0x41   :  { %509 = vmatmul.bf16.vlgmr.msrb.gmra.mxu0 %v46_v61  ;;  %617 = vmatpush.bf16.msrb.mxu3 %v1859_v8  ;;  %v1729_v61 = vld [vmem:[%s2629_s7 + $0x120] sm:$0xf]  ;;  %v1701_v8 = vld [vmem:[%s2629_s7 + $0xe8] sm:$0xf] }
  0x42   :  { %522 = vmatmul.bf16.vlgmr.msrb.gmra.mxu1 %v47_v62  ;;  %1077 = vmatpush.bf16.msra.mxu0 %v1778_v42  ;;  %v1914_v62 = vld [vmem:[%s2629_s7 + $0x138] sm:$0xf0]  ;;  %v1583_v58 = vld [vmem:[%s2629_s7 + $0x1c] sm:$0xf0] }
  0x43   :  { %1090 = vmatpush.bf16.msra.mxu1 %v1782_v46  ;;  %v1730_v3 = vor.u32 %v1914_v62, %v1729_v61  ;;  %v1675_v46 = vld [vmem:[%s2629_s7 + $0xcc] sm:$0xf0]  ;;  %v1793_v62 = vld [vmem:[%s2629_s7 + $0x198] sm:$0xf] }
  0x44   :  { %701 = vmatpush.bf16.msra.mxu2 %v1867_v38  ;;  %v1678_v54 = vor.u32 %v1897_v45, %v1675_v46  ;;  %v1717_v46 = vld [vmem:[%s2629_s7 + $0xf8] sm:$0xf] }
  0x45   :  { %1103 = vmatpush.bf16.msra.mxu3 %v1786_v47  ;;  %v1611_v47 = vld [vmem:[%s2629_s7 + $0x54] sm:$0xf0] }
  0x46   :  { %1078 = vmatpush.bf16.msra.mxu0 %v1750_v51  ;;  %v1581_v51 = vld [vmem:[%s2629_s7] sm:$0xf] }
  0x47   :  { %1091 = vmatpush.bf16.msra.mxu1 %v1754_v55 }
  0x49   :  { %1104 = vmatpush.bf16.msra.mxu3 %v1758_v56  ;;  %v1614_v56 = vor.u32 %v1882_v44, %v1611_v47  ;;  %v1909_v47 = vld [vmem:[%s2629_s7 + $0x110] sm:$0xf0] }
  0x4a   :  { %1079 = vmatpush.bf16.msra.mxu0 %v1722_v63  ;;  %v1929_v63 = vld [vmem:[%s2629_s7 + $0x1b0] sm:$0xf0]  ;;  %v1718_v48 = vor.u32 %v1909_v47, %v1717_v46 }
  0x4b   :  { %1092 = vmatpush.bf16.msra.mxu1 %v1726_v2  ;;  %v1801_v2 = vld [vmem:[%s2629_s7 + $0x1a0] sm:$0xf] }
  0x4d   :  { %1105 = vmatpush.bf16.msra.mxu3 %v1730_v3  ;;  %v1930_v3 = vld [vmem:[%s2629_s7 + $0x1b8] sm:$0xf0] }
  0x9e   :  { %v458_v6 = vpop.f32.mrf.mxu0 }
  0x9f   :  { %v471_v7 = vpop.f32.mrf.mxu1  ;;  %v459_v17 = vadd.f32 %v1931_v15, %v458_v6  ;;  %v1787_v6 = vld [vmem:[%s2629_s7 + $0x1ac] sm:$0xf0]  ;;  %v1759_v15 = vld [vmem:[%s2629_s7 + $0x174] sm:$0xf0] }
  0xa1   :  { %v472_v21 = vadd.f32 %v471_v7, %v459_v17  ;;  %v1695_v7 = vld [vmem:[%s2629_s7 + $0xfc] sm:$0xf0] }
  0xa2   :  { %v1698_v16 = vor.u32 %v1903_v4, %v1695_v7  ;;  %v1647_v7 = vld [vmem:[%s2629_s7 + $0x94] sm:$0xf0] }
  0xa4   :  { %1093 = vmatpush.bf16.msra.mxu1 %v1698_v16  ;;  %v1922_v16 = vld [vmem:[%s2629_s7 + $0x178] sm:$0xf0] }
  0xa6   :  { %v460_v9 = vpop.f32.mrf.mxu0  ;;  %v484_v12 = vpop.f32.mrf.mxu2 }
  0xa7   :  { %v473_v10 = vpop.f32.mrf.mxu1  ;;  %v497_v13 = vpop.f32.mrf.mxu3  ;;  %v485_v23 = vadd.f32 %v484_v12, %v472_v21  ;;  %v1907_v9 = vld [vmem:[%s2629_s7 + $0x100] sm:$0xf0]  ;;  %v1694_v12 = vor.u32 %v1906_v1, %v1693_v0  ;;  %v1762_v21 = vor.u32 %v1918_v11, %v1759_v15  ;;  %v1926_v0 = vld [vmem:[%s2629_s7 + $0x19c] sm:$0xf]  ;;  %v1795_v1 = vld [vmem:[%s2629_s7 + $0x1b4] sm:$0xf0]  ;;  %v1794_v11 = vor.u32 %v1929_v63, %v1793_v62 }
  0xa8   :  { %v1790_v10 = vor.u32 %v1925_v5, %v1787_v6  ;;  %v1702_v17 = vor.u32 %v1907_v9, %v1701_v8  ;;  %v1582_v5 = vor.u32 %v1878_v52, %v1581_v51  ;;  %v1890_v6 = vld [vmem:[%s2629_s7 + $0x7c] sm:$0xf]  ;;  %v1586_v8 = vor.u32 %v1875_v53, %v1583_v58  ;;  %v1683_v53 = vld [vmem:[%s2629_s7 + $0xd4] sm:$0xf0]  ;;  %v1653_v58 = vld [vmem:[%s2629_s7 + $0x80] sm:$0xf] }
  0xa9   :  { %v498_v26 = vadd.f32 %v497_v13, %v485_v23  ;;  %v1665_v13 = vld [vmem:[%s2629_s7 + $0xa8] sm:$0xf]  ;;  %v1911_v23 = vld [vmem:[%s2629_s7 + $0x124] sm:$0xf]  ;;  %1080 = vmatpush.bf16.msra.mxu0 %v1694_v12  ;;  %v1590_v9 = vor.u32 %v1879_v60, %v1589_v59  ;;  %v1798_v12 = vor.u32 %v1926_v0, %v1795_v1  ;;  %v1650_v15 = vor.u32 %v1890_v6, %v1647_v7  ;;  %v1898_v51 = vld [vmem:[%s2629_s7 + $0xbc] sm:$0xf] }
  0xaa   :  { %1116 = vmatpush.bf16.msrb.mxu2 %v1790_v10  ;;  %v1666_v25 = vor.u32 %v1899_v14, %v1665_v13  ;;  %1106 = vmatpush.bf16.msra.mxu3 %v1702_v17  ;;  %v1765_v13 = vld [vmem:[%s2629_s7 + $0x160] sm:$0xf]  ;;  %v1802_v14 = vor.u32 %v1930_v3, %v1801_v2  ;;  %v1919_v17 = vld [vmem:[%s2629_s7 + $0x164] sm:$0xf]  ;;  %v1894_v59 = vld [vmem:[%s2629_s7 + $0x98] sm:$0xf0] }
  0xab   :  { %v1891_v60 = vld [vmem:[%s2629_s7 + $0x84] sm:$0xf]  ;;  %v1655_v62 = vld [vmem:[%s2629_s7 + $0x9c] sm:$0xf0]  ;;  %v1661_v63 = vld [vmem:[%s2629_s7 + $0x88] sm:$0xf] }
  0xac   :  { %v1895_v0 = vld [vmem:[%s2629_s7 + $0xa0] sm:$0xf0]  ;;  %v1658_v1 = vor.u32 %v1891_v60, %v1655_v62  ;;  %v1625_v3 = vld [vmem:[%s2629_s7 + $0x48] sm:$0xf]  ;;  %v1633_v7 = vld [vmem:[%s2629_s7 + $0x50] sm:$0xf] }
  0xad   :  { %1081 = vmatpush.bf16.msra.mxu0 %v1666_v25  ;;  %v1883_v25 = vld [vmem:[%s2629_s7 + $0x44] sm:$0xf]  ;;  %v1662_v2 = vor.u32 %v1895_v0, %v1661_v63  ;;  %v1627_v6 = vld [vmem:[%s2629_s7 + $0x64] sm:$0xf0] }
  0xae   :  { %v486_v18 = vpop.f32.mrf.mxu2  ;;  %1117 = vmatpush.bf16.msrb.mxu2 %v1762_v21 }
  0xaf   :  { %v499_v19 = vpop.f32.mrf.mxu3  ;;  %v1896_v18 = vld [vmem:[%s2629_s7 + $0xac] sm:$0xf] }
  0xb0   :  { %v1667_v19 = vld [vmem:[%s2629_s7 + $0xc4] sm:$0xf0] }
  0xb6   :  { %v536_v24 = vpop.f32.mrf.mxu2 }
  0xbe   :  { %v510_v27 = vpop.f32.mrf.mxu0  ;;  %v538_v31 = vpop.f32.mrf.mxu2 }
  0xbf   :  { %v523_v28 = vpop.f32.mrf.mxu1  ;;  %v511_v29 = vadd.f32 %v510_v27, %v498_v26  ;;  %v1637_v26 = vld [vmem:[%s2629_s7 + $0x70] sm:$0xf]  ;;  %v1892_v27 = vld [vmem:[%s2629_s7 + $0x88] sm:$0xf0]  ;;  %v1889_v31 = vld [vmem:[%s2629_s7 + $0x74] sm:$0xf] }
  0xc0   :  { %v1638_v38 = vor.u32 %v1892_v27, %v1637_v26  ;;  %v1619_v26 = vld [vmem:[%s2629_s7 + $0x5c] sm:$0xf0]  ;;  %v1737_v27 = vld [vmem:[%s2629_s7 + $0x128] sm:$0xf] }
  0xc1   :  { %v524_v30 = vadd.f32 %v523_v28, %v511_v29  ;;  %v1670_v29 = vor.u32 %v1896_v18, %v1667_v19  ;;  %v1767_v18 = vld [vmem:[%s2629_s7 + $0x17c] sm:$0xf0]  ;;  %v1773_v19 = vld [vmem:[%s2629_s7 + $0x168] sm:$0xf] }
  0xc2   :  { %1082 = vmatpush.bf16.msra.mxu0 %v1638_v38  ;;  %v1591_v38 = vld [vmem:[%s2629_s7 + $0x24] sm:$0xf0] }
  0xc3   :  { %v537_v32 = vadd.f32 %v536_v24, %v524_v30  ;;  %v1731_v24 = vld [vmem:[%s2629_s7 + $0x13c] sm:$0xf0]  ;;  %v1674_v30 = vor.u32 %v1900_v22, %v1673_v20  ;;  %1094 = vmatpush.bf16.msra.mxu1 %v1670_v29  ;;  %v1923_v20 = vld [vmem:[%s2629_s7 + $0x180] sm:$0xf0]  ;;  %v1766_v22 = vor.u32 %v1922_v16, %v1765_v13  ;;  %v1880_v13 = vld [vmem:[%s2629_s7 + $0x28] sm:$0xf0] }
  0xc4   :  { %v1734_v28 = vor.u32 %v1911_v23, %v1731_v24  ;;  %v1770_v23 = vor.u32 %v1919_v17, %v1767_v18  ;;  %v1774_v24 = vor.u32 %v1923_v20, %v1773_v19  ;;  %v1915_v29 = vld [vmem:[%s2629_s7 + $0x140] sm:$0xf0]  ;;  %v1605_v16 = vld [vmem:[%s2629_s7 + $0x18] sm:$0xf]  ;;  %v1881_v17 = vld [vmem:[%s2629_s7 + $0x30] sm:$0xf0] }
  0xc5   :  { %v540_v33 = vmax.f32 %v537_v32, 0.0  ;;  %v1904_v32 = vld [vmem:[%s2629_s7 + $0xec] sm:$0xf]  ;;  %1107 = vmatpush.bf16.msra.mxu3 %v1674_v30  ;;  %v1606_v20 = vor.u32 %v1881_v17, %v1605_v16 }
  0xc6   :  { %v512_v34 = vpop.f32.mrf.mxu0  ;;  %1118 = vmatpush.bf16.msrb.mxu2 %v1734_v28  ;;  %1083 = vmatpush.bf16.msra.mxu0 %v1610_v50  ;;  %v1622_v28 = vor.u32 %v1883_v25, %v1619_v26  ;;  %v1912_v30 = vld [vmem:[%s2629_s7 + $0x12c] sm:$0xf]  ;;  %v1901_v50 = vld [vmem:[%s2629_s7 + $0xd0] sm:$0xf0] }
  0xc7   :  { %v525_v35 = vpop.f32.mrf.mxu1  ;;  %v541_v36 = vpack.c.bf16 %v540_v33, %v540_v33  ;;  %v1703_v33 = vld [vmem:[%s2629_s7 + $0x104] sm:$0xf0]  ;;  %v1639_v34 = vld [vmem:[%s2629_s7 + $0x8c] sm:$0xf0]  ;;  %v1682_v52 = vor.u32 %v1901_v50, %v1681_v49 }
  0xc8   :  { %v1645_v35 = vld [vmem:[%s2629_s7 + $0x78] sm:$0xf]  ;;  %v1706_v41 = vor.u32 %v1904_v32, %v1703_v33  ;;  %v1642_v42 = vor.u32 %v1889_v31, %v1639_v34  ;;  %v1739_v31 = vld [vmem:[%s2629_s7 + $0x144] sm:$0xf0]  ;;  %v1738_v32 = vor.u32 %v1915_v29, %v1737_v27  ;;  %v1745_v34 = vld [vmem:[%s2629_s7 + $0x130] sm:$0xf] }
  0xc9   :  { %618 = vmatmul.bf16.vlgmr.msrb.gmra.mxu3 %v541_v36  ;;  %v1893_v36 = vld [vmem:[%s2629_s7 + $0x90] sm:$0xf0]  ;;  %v1742_v33 = vor.u32 %v1912_v30, %v1739_v31  ;;  %v2586_v27 = vld [vmem:[%s2631_s8] sm:$0x7f] }
  0xca   :  { %v1646_v43 = vor.u32 %v1893_v36, %v1645_v35  ;;  %1119 = vmatpush.bf16.msrb.mxu2 %v1706_v41  ;;  %1095 = vmatpush.bf16.msra.mxu1 %v1642_v42  ;;  %v1916_v35 = vld [vmem:[%s2629_s7 + $0x148] sm:$0xf0]  ;;  %v1905_v42 = vld [vmem:[%s2629_s7 + $0xf4] sm:$0xf]  ;;  %v776_v29 = vperm.slane %v2586_v27, 1  ;;  %v779_v50 = vperm.slane %v2586_v27, 4 }
  0xcb   :  { %1084 = vmatpush.bf16.msra.mxu0 %v1582_v5  ;;  %v1746_v36 = vor.u32 %v1916_v35, %v1745_v34  ;;  %v1908_v41 = vld [vmem:[%s2629_s7 + $0x108] sm:$0xf0] }
  0xcc   :  { %1108 = vmatpush.bf16.msra.mxu3 %v1646_v43  ;;  %v1711_v43 = vld [vmem:[%s2629_s7 + $0x10c] sm:$0xf0]  ;;  %v1710_v44 = vor.u32 %v1908_v41, %v1709_v39  ;;  %v1884_v5 = vld [vmem:[%s2629_s7 + $0x4c] sm:$0xf] }
  0xcd   :  { %v1714_v45 = vor.u32 %v1905_v42, %v1711_v43 }
  0xce   :  { %1120 = vmatpush.bf16.msrb.mxu2 %v1678_v54  ;;  %1096 = vmatpush.bf16.msra.mxu1 %v1614_v56  ;;  %v1689_v54 = vld [vmem:[%s2629_s7 + $0xc0] sm:$0xf]  ;;  %v1686_v56 = vor.u32 %v1898_v51, %v1683_v53  ;;  %v780_v51 = vperm.slane %v2586_v27, 5 }
  0xcf   :  { %1129 = vmatpush.bf16.msrb.mxu0 %v1794_v11 }
  0xd0   :  { %1109 = vmatpush.bf16.msra.mxu3 %v1618_v57 }
  0xd2   :  { %1097 = vmatpush.bf16.msra.mxu1 %v1586_v8  ;;  %1121 = vmatpush.bf16.msrb.mxu2 %v1650_v15  ;;  %v1888_v8 = vld [vmem:[%s2629_s7 + $0x68] sm:$0xf0]  ;;  %v1599_v15 = vld [vmem:[%s2629_s7 + $0x2c] sm:$0xf0] }
  0xd3   :  { %1130 = vmatpush.bf16.msrb.mxu0 %v1766_v22  ;;  %v1634_v11 = vor.u32 %v1888_v8, %v1633_v7 }
  0xd4   :  { %1110 = vmatpush.bf16.msra.mxu3 %v1590_v9 }
  0xd6   :  { %1142 = vmatpush.bf16.msrb.mxu1 %v1798_v12  ;;  %1122 = vmatpush.bf16.msrb.mxu2 %v1622_v28  ;;  %v1597_v12 = vld [vmem:[%s2629_s7 + $0x10] sm:$0xf]  ;;  %v775_v28 = vperm.slane %v2586_v27, 0 }
  0xd7   :  { %1131 = vmatpush.bf16.msrb.mxu0 %v1738_v32  ;;  %v1598_v18 = vor.u32 %v1880_v13, %v1597_v12 }
  0xd8   :  { %1155 = vmatpush.bf16.msrb.mxu3 %v1802_v14  ;;  %v1877_v14 = vld [vmem:[%s2629_s7 + $0x14] sm:$0xf] }
  0xd9   :  { %v1602_v19 = vor.u32 %v1877_v14, %v1599_v15 }
  0xda   :  { %1143 = vmatpush.bf16.msrb.mxu1 %v1770_v23 }
  0xdb   :  { %1132 = vmatpush.bf16.msrb.mxu0 %v1710_v44 }
  0xdc   :  { %1156 = vmatpush.bf16.msrb.mxu3 %v1774_v24 }
  0xde   :  { %1144 = vmatpush.bf16.msrb.mxu1 %v1742_v33 }
  0xdf   :  { %1133 = vmatpush.bf16.msrb.mxu0 %v1682_v52 }
  0xe0   :  { %1157 = vmatpush.bf16.msrb.mxu3 %v1746_v36  ;;  %v777_v36 = vperm.slane %v2586_v27, 2 }
  0xe2   :  { %1145 = vmatpush.bf16.msrb.mxu1 %v1714_v45 }
  0xe4   :  { %1158 = vmatpush.bf16.msrb.mxu3 %v1718_v48 }
  0xe6   :  { %1146 = vmatpush.bf16.msrb.mxu1 %v1686_v56 }
  0xea   :  { %1147 = vmatpush.bf16.msrb.mxu1 %v1658_v1 }
 0x14c   :  { %v619_v55 = vpop.f32.mrf.mxu3 }
 0x14d   :  { %v620_v61 = vadd.f32 %v1932_v37, %v619_v55  ;;  %v1876_v37 = vld [vmem:[%s2629_s7 + $0xc] sm:$0xf]  ;;  %v1902_v55 = vld [vmem:[%s2629_s7 + $0xd8] sm:$0xf0] }
 0x14e   :  { %v1594_v40 = vor.u32 %v1876_v37, %v1591_v38  ;;  %v1690_v57 = vor.u32 %v1902_v55, %v1689_v54  ;;  %v778_v37 = vperm.slane %v2586_v27, 3 }
 0x14f   :  { %v623_v4 = vmax.f32 %v620_v61, 0.0  ;;  %v1654_v61 = vor.u32 %v1894_v59, %v1653_v58 }
 0x150   :  { %1123 = vmatpush.bf16.msrb.mxu2 %v1594_v40  ;;  %1159 = vmatpush.bf16.msrb.mxu3 %v1690_v57 }
 0x151   :  { %624 = vst.msk [vmem:[%s2630_s10] sm:$0xff] %vm445_vm0, %v623_v4  ;;  %v625_v10 = vpack.c.bf16 %v623_v4, %v623_v4  ;;  %v1887_v4 = vld [vmem:[%s2629_s7 + $0x60] sm:$0xf0]  ;;  %1134 = vmatpush.bf16.msrb.mxu0 %v1654_v61 }
 0x152   :  { %v1626_v9 = vor.u32 %v1887_v4, %v1625_v3 }
 0x153   :  { %702 = vmatmul.bf16.vlgmr.msra.gmra.mxu2 %v625_v10  ;;  %v1630_v10 = vor.u32 %v1884_v5, %v1627_v6 }
 0x154   :  { %v621_v21 = vpop.f32.mrf.mxu3  ;;  %1160 = vmatpush.bf16.msrb.mxu3 %v1662_v2  ;;  %v781_v2 = vperm.slane %v2586_v27, 6 }
 0x155   :  { %1135 = vmatpush.bf16.msrb.mxu0 %v1626_v9  ;;  %1148 = vmatpush.bf16.msrb.mxu1 %v1630_v10  ;;  %v1933_v21 = vld [vmem:[%s2628_s6] ss:$0 sm:$0xff] }
 0x158   :  { %1161 = vmatpush.bf16.msrb.mxu3 %v1634_v11 }
 0x159   :  { %1136 = vmatpush.bf16.msrb.mxu0 %v1598_v18  ;;  %1149 = vmatpush.bf16.msrb.mxu1 %v1602_v19 }
 0x15c   :  { %1162 = vmatpush.bf16.msrb.mxu3 %v1606_v20 }
 0x1d6   :  { %v703_v22 = vpop.f32.mrf.mxu2 }
 0x1d7   :  { %v704_v23 = vadd.f32 %v1933_v21, %v703_v22 }
 0x1d9   :  { %v707_v24 = vmax.f32 %v704_v23, 0.0 }
 0x1db   :  { %v708_v25 = vpack.c.bf16 %v707_v24, %v707_v24 }
 0x1dd   :  { %1085 = vmatmul.bf16.vlgmr.msra.gmra.mxu0 %v708_v25  ;;  %1098 = vmatmul.bf16.vlgmr.msra.gmra.mxu1 %v708_v25 }
 0x1de   :  { %1111 = vmatmul.bf16.vlgmr.msra.gmra.mxu3 %v708_v25  ;;  %1124 = vmatmul.bf16.vlgmr.msrb.gmra.mxu2 %v708_v25  ;;  %v705_v26 = vpop.f32.mrf.mxu2 }
 0x1ed   :  { %1137 = vmatmul.bf16.vlgmr.msrb.gmra.mxu0 %v708_v25  ;;  %1150 = vmatmul.bf16.vlgmr.msrb.gmra.mxu1 %v708_v25 }
 0x1ee   :  { %1163 = vmatmul.bf16.vlgmr.msrb.gmra.mxu3 %v708_v25 }
 0x25a   :  { %v1086_v30 = vpop.f32.mrf.mxu0  ;;  %v1099_v31 = vpop.f32.mrf.mxu1 }
 0x25b   :  { %v1087_v32 = vadd.f32 %v1086_v30, %v775_v28  ;;  %v1100_v33 = vadd.f32 %v1099_v31, %v776_v29 }
 0x25d   :  { %v1803_v34 = vmul.f32 -1.442695, %v1087_v32  ;;  %v1804_v35 = vmul.f32 -1.442695, %v1100_v33 }
 0x25f   :  { %1934 = vpow2.f32 %v1803_v34 }
 0x260   :  { %1936 = vpow2.f32 %v1804_v35 }
 0x261   :  { %v1112_v38 = vpop.f32.mrf.mxu3  ;;  %v1125_v39 = vpop.f32.mrf.mxu2 }
 0x262   :  { %v1113_v40 = vadd.f32 %v1112_v38, %v777_v36  ;;  %v1126_v41 = vadd.f32 %v1125_v39, %v778_v37  ;;  %v1088_v42 = vpop.f32.mrf.mxu0  ;;  %v1101_v43 = vpop.f32.mrf.mxu1 }
 0x264   :  { %v1805_v44 = vmul.f32 -1.442695, %v1113_v40  ;;  %v1806_v45 = vmul.f32 -1.442695, %v1126_v41 }
 0x265   :  { %v1935_v46 = vpop.eup %1934 }
 0x266   :  { %v1937_v47 = vpop.eup %1936  ;;  %v1189_v48 = vadd.f32 1.0, %v1935_v46  ;;  %1938 = vpow2.f32 %v1805_v44 }
 0x267   :  { %v1190_v49 = vadd.f32 1.0, %v1937_v47  ;;  %1940 = vpow2.f32 %v1806_v45 }
 0x268   :  { %1942 = vrcp.f32 %v1189_v48  ;;  %v1205_v6 = vand.u32 2147483647, %v1189_v48  ;;  %v1207_v8 = vand.u32 2147483648, %v1189_v48  ;;  %vm1201_vm3 = vweird.f32 %v1189_v48 }
 0x269   :  { %1944 = vrcp.f32 %v1190_v49  ;;  %v1114_v52 = vpop.f32.mrf.mxu3  ;;  %v1127_v53 = vpop.f32.mrf.mxu2  ;;  %v1220_v10 = vand.u32 2147483647, %v1190_v49  ;;  %v1222_v11 = vand.u32 2147483648, %v1190_v49  ;;  %vm1216_vm4 = vweird.f32 %v1190_v49 }
 0x26a   :  { %v1138_v54 = vpop.f32.mrf.mxu0  ;;  %v1151_v55 = vpop.f32.mrf.mxu1  ;;  %vm1206_vm6 = vcmp.eq.f32.partialorder %v1205_v6, 8.507059e+37  ;;  %v1208_v20 = vor.u32 1.1754944e-38, %v1207_v8 }
 0x26b   :  { %v1139_v56 = vadd.f32 %v1138_v54, %v779_v50  ;;  %v1152_v58 = vadd.f32 %v1151_v55, %v780_v51  ;;  %vm1221_vm8 = vcmp.eq.f32.partialorder %v1220_v10, 8.507059e+37  ;;  %v1223_v25 = vor.u32 1.1754944e-38, %v1222_v11 }
 0x26c   :  { %v1939_v57 = vpop.eup %1938 }
 0x26d   :  { %v1941_v59 = vpop.eup %1940  ;;  %v2594_v60 = vadd.f32 1.0, %v1939_v57  ;;  %v1807_v1 = vmul.f32 -1.442695, %v1139_v56  ;;  %v1808_v4 = vmul.f32 -1.442695, %v1152_v58 }
 0x26e   :  { %v1943_v61 = vpop.eup %1942  ;;  %v2596_v62 = vadd.f32 1.0, %v1941_v59 }
 0x26f   :  { %v1945_v63 = vpop.eup %1944  ;;  %v1197_v0 = vmul.f32 %v1943_v61, %v1189_v48  ;;  %1946 = vrcp.f32 %v2594_v60  ;;  %vm1202_vm1 = vweird.f32 %v1943_v61  ;;  %v1235_v32 = vand.u32 2147483647, %v2594_v60 }
 0x270   :  { %v1212_v3 = vmul.f32 %v1945_v63, %v1190_v49  ;;  %1948 = vrcp.f32 %v2596_v62  ;;  %vm1217_vm2 = vweird.f32 %v1945_v63  ;;  %vm1203_vm5 = vmor %vm1201_vm3, %vm1202_vm1  ;;  %v1237_v33 = vand.u32 2147483648, %v2594_v60 }
 0x271   :  { %v1198_v5 = vsub.f32 1.0, %v1197_v0  ;;  %v1164_v7 = vpop.f32.mrf.mxu3  ;;  %1950 = vpow2.f32 %v1807_v1  ;;  %vm1218_vm7 = vmor %vm1216_vm4, %vm1217_vm2  ;;  %vm1231_vm10 = vweird.f32 %v2594_v60  ;;  %v1250_v40 = vand.u32 2147483647, %v2596_v62 }
 0x272   :  { %v1213_v9 = vsub.f32 1.0, %v1212_v3  ;;  %v1140_v12 = vpop.f32.mrf.mxu0  ;;  %v1153_v13 = vpop.f32.mrf.mxu1  ;;  %v1165_v15 = vadd.f32 %v1164_v7, %v781_v2  ;;  %1952 = vpow2.f32 %v1808_v4  ;;  %v1252_v41 = vand.u32 2147483648, %v2596_v62 }
 0x273   :  { %v1199_v14 = vmul.f32 %v1943_v61, %v1198_v5  ;;  %v1238_v46 = vor.u32 1.1754944e-38, %v1237_v33  ;;  %vm1236_vm13 = vcmp.eq.f32.partialorder %v1235_v32, 8.507059e+37  ;;  %vm1246_vm14 = vweird.f32 %v2596_v62 }
 0x274   :  { %v1214_v16 = vmul.f32 %v1945_v63, %v1213_v9  ;;  %v1809_v19 = vmul.f32 -1.442695, %v1165_v15  ;;  %v1253_v50 = vor.u32 1.1754944e-38, %v1252_v41  ;;  %vm1251_vm0 = vcmp.eq.f32.partialorder %v1250_v40, 8.507059e+37 }
 0x275   :  { %v1947_v17 = vpop.eup %1946  ;;  %v1200_v18 = vadd.f32 %v1943_v61, %v1199_v14 }
 0x276   :  { %v1215_v21 = vadd.f32 %v1945_v63, %v1214_v16  ;;  %v1227_v22 = vmul.f32 %v1947_v17, %v2594_v60  ;;  %v1949_v23 = vpop.eup %1948  ;;  %1954 = vpow2.f32 %v1809_v19  ;;  %vm1232_vm9 = vweird.f32 %v1947_v17 }
 0x277   :  { %v1204_v24 = vsel %vm1203_vm5, %v1943_v61, %v1200_v18  ;;  %v1242_v29 = vmul.f32 %v1949_v23, %v2596_v62  ;;  %v1951_v30 = vpop.eup %1950  ;;  %vm1247_vm11 = vweird.f32 %v1949_v23  ;;  %vm1233_vm12 = vmor %vm1231_vm10, %vm1232_vm9 }
 0x278   :  { %v1209_v26 = vsel %vm1206_vm6, %v1208_v20, %v1204_v24  ;;  %v1219_v27 = vsel %vm1218_vm7, %v1945_v63, %v1215_v21  ;;  %v1228_v28 = vsub.f32 1.0, %v1227_v22  ;;  %v1953_v35 = vpop.eup %1952  ;;  %v1193_v39 = vadd.f32 1.0, %v1951_v30  ;;  %vm1248_vm15 = vmor %vm1246_vm14, %vm1247_vm11 }
 0x279   :  { %v1224_v31 = vsel %vm1221_vm8, %v1223_v25, %v1219_v27  ;;  %v1166_v34 = vpop.f32.mrf.mxu3  ;;  %v1243_v38 = vsub.f32 1.0, %v1242_v29  ;;  %v1194_v42 = vadd.f32 1.0, %v1953_v35 }
 0x27a   :  { %v1301_v36 = vpack.c.bf16 %v1224_v31, %v1209_v26  ;;  %v1229_v37 = vmul.f32 %v1947_v17, %v1228_v28  ;;  %1956 = vrcp.f32 %v1193_v39  ;;  %v1265_v60 = vand.u32 2147483647, %v1193_v39 }
 0x27b   :  { %v1244_v44 = vmul.f32 %v1949_v23, %v1243_v38  ;;  %1958 = vrcp.f32 %v1194_v42  ;;  %v1267_v61 = vand.u32 2147483648, %v1193_v39  ;;  %v1280_v63 = vand.u32 2147483647, %v1194_v42 }
 0x27c   :  { %1305 = vst [vmem:[%s2632_s9] sm:$0xff] %v1301_v36  ;;  %v1230_v43 = vadd.f32 %v1947_v17, %v1229_v37  ;;  %v1955_v45 = vpop.eup %1954  ;;  %v1282_v2 = vand.u32 2147483648, %v1194_v42  ;;  %vm1261_vm3 = vweird.f32 %v1193_v39  ;;  %vm1266_vm4 = vcmp.eq.f32.partialorder %v1265_v60, 8.507059e+37 }
 0x27d   :  { %v1245_v48 = vadd.f32 %v1949_v23, %v1244_v44  ;;  %v1195_v51 = vadd.f32 1.0, %v1955_v45  ;;  %vm1276_vm5 = vweird.f32 %v1194_v42  ;;  %v1268_v6 = vor.u32 1.1754944e-38, %v1267_v61 }
 0x27e   :  { %v1234_v47 = vsel %vm1233_vm12, %v1947_v17, %v1230_v43  ;;  %vm1281_vm7 = vcmp.eq.f32.partialorder %v1280_v63, 8.507059e+37  ;;  %v1283_v10 = vor.u32 1.1754944e-38, %v1282_v2 }
 0x27f   :  { %v1239_v49 = vsel %vm1236_vm13, %v1238_v46, %v1234_v47  ;;  %v1249_v52 = vsel %vm1248_vm15, %v1949_v23, %v1245_v48  ;;  %1960 = vrcp.f32 %v1195_v51  ;;  %v1295_v11 = vand.u32 2147483647, %v1195_v51 }
 0x280   :  { %v1254_v53 = vsel %vm1251_vm0, %v1253_v50, %v1249_v52  ;;  %v1957_v54 = vpop.eup %1956  ;;  %v1297_v12 = vand.u32 2147483648, %v1195_v51  ;;  %vm1291_vm10 = vweird.f32 %v1195_v51  ;;  %vm1308_vm13 = vcmask 125952  }
 0x281   :  { %v1302_v55 = vpack.c.bf16 %v1254_v53, %v1239_v49  ;;  %v1959_v56 = vpop.eup %1958  ;;  %v1257_v57 = vmul.f32 %v1957_v54, %v1193_v39  ;;  %vm1262_vm1 = vweird.f32 %v1957_v54  ;;  %vm1296_vm12 = vcmp.eq.f32.partialorder %v1295_v11, 8.507059e+37 }
 0x282   :  { %v1272_v58 = vmul.f32 %v1959_v56, %v1194_v42  ;;  %vm1277_vm2 = vweird.f32 %v1959_v56  ;;  %vm1263_vm6 = vmor %vm1261_vm3, %vm1262_vm1  ;;  %v1298_v19 = vor.u32 1.1754944e-38, %v1297_v12 }
 0x283   :  { %1306 = vst [vmem:[%s2632_s9 + $0x8] sm:$0xff] %v1302_v55  ;;  %v1258_v59 = vsub.f32 1.0, %v1257_v57  ;;  %vm1278_vm8 = vmor %vm1276_vm5, %vm1277_vm2 }
 0x284   :  { %v1273_v62 = vsub.f32 1.0, %v1272_v58 }
 0x285   :  { %v1961_v0 = vpop.eup %1960  ;;  %v1259_v1 = vmul.f32 %v1957_v54, %v1258_v59 }
 0x286   :  { %v1274_v3 = vmul.f32 %v1959_v56, %v1273_v62  ;;  %v1287_v4 = vmul.f32 %v1961_v0, %v1195_v51  ;;  %vm1292_vm9 = vweird.f32 %v1961_v0 }
 0x287   :  { %v1260_v5 = vadd.f32 %v1957_v54, %v1259_v1  ;;  %vm1293_vm11 = vmor %vm1291_vm10, %vm1292_vm9 }
 0x288   :  { %v1275_v7 = vadd.f32 %v1959_v56, %v1274_v3  ;;  %v1288_v8 = vsub.f32 1.0, %v1287_v4 }
 0x289   :  { %v1264_v9 = vsel %vm1263_vm6, %v1957_v54, %v1260_v5 }
 0x28a   :  { %v1269_v13 = vsel %vm1266_vm4, %v1268_v6, %v1264_v9  ;;  %v1279_v14 = vsel %vm1278_vm8, %v1959_v56, %v1275_v7  ;;  %v1289_v15 = vmul.f32 %v1961_v0, %v1288_v8 }
 0x28b   :  { %v1284_v16 = vsel %vm1281_vm7, %v1283_v10, %v1279_v14 }
 0x28c   :  { %v1303_v17 = vpack.c.bf16 %v1284_v16, %v1269_v13  ;;  %v1290_v18 = vadd.f32 %v1961_v0, %v1289_v15 }
 0x28e   :  { %1307 = vst [vmem:[%s2632_s9 + $0x10] sm:$0xff] %v1303_v17  ;;  %v1294_v20 = vsel %vm1293_vm11, %v1961_v0, %v1290_v18 }
 0x28f   :  { %v1299_v21 = vsel %vm1296_vm12, %v1298_v19, %v1294_v20 }
 0x290   :  { %v1304_v22 = vpack.c.bf16 %v1299_v21, %v1299_v21 }
 0x292   :  { %1309 = vst.msk [vmem:[%s2632_s9 + $0x18] sm:$0xf] %vm1308_vm13, %v1304_v22 }

</bundles_post_ra>
